<compile_context>
chip_gen: v5e
topology: v5e:2x2
jax: 0.10.0
libtpu: 0.0.40
codegen_flags: <defaults>
</compile_context>

<pallas_src>
import functools

import jax
import jax.numpy as jnp
from jax.experimental import pallas as pl
from jax.experimental.pallas import tpu as pltpu


# ----------------------------------------------------------------------------
# tiling helper: pick a row-tile (multiple of 8) and padded row count;
# keep >=2 grid blocks when possible so both v7x TensorCores are used.
# ----------------------------------------------------------------------------
def _choose_tiles(M, tm_req):
    M8 = ((M + 7) // 8) * 8
    tm = min(((tm_req + 7) // 8) * 8, M8)
    if M8 // tm < 2 and M8 >= 16:
        tm = ((M8 // 2 + 7) // 8) * 8
    M_pad = ((M8 + tm - 1) // tm) * tm
    return tm, M_pad


# ----------------------------------------------------------------------------
# Pallas kernel 1: plain LayerNorm (PreNorm.norm)
# ----------------------------------------------------------------------------
def _ln_kernel(x_ref, g_ref, b_ref, o_ref, *, eps):
    x = x_ref[...].astype(jnp.float32)                    # (tm, D)
    mean = jnp.mean(x, axis=-1, keepdims=True)
    xc = x - mean
    var = jnp.mean(xc * xc, axis=-1, keepdims=True)
    y = xc * jax.lax.rsqrt(var + eps) * g_ref[...] + b_ref[...]
    o_ref[...] = y.astype(o_ref.dtype)


def layer_norm(x, gamma, beta, eps=1e-5, tm_req=256):
    """LayerNorm over the last dim of x (any leading shape)."""
    orig_shape = x.shape
    D = orig_shape[-1]
    x2 = x.reshape(-1, D)
    M = x2.shape[0]
    tm, M_pad = _choose_tiles(M, tm_req)
    if M_pad != M:
        x2 = jnp.pad(x2, ((0, M_pad - M), (0, 0)))
    g2 = gamma.reshape(1, D).astype(jnp.float32)
    b2 = beta.reshape(1, D).astype(jnp.float32)

    out = pl.pallas_call(
        functools.partial(_ln_kernel, eps=eps),
        out_shape=jax.ShapeDtypeStruct((M_pad, D), x.dtype),
        grid=(M_pad // tm,),
        in_specs=[
            pl.BlockSpec((tm, D), lambda i: (i, 0)),   # x row tile
            pl.BlockSpec((1, D), lambda i: (0, 0)),    # gamma (resident)
            pl.BlockSpec((1, D), lambda i: (0, 0)),    # beta  (resident)
        ],
        out_specs=pl.BlockSpec((tm, D), lambda i: (i, 0)),
        compiler_params=pltpu.CompilerParams(dimension_semantics=("parallel",)),
    )(x2, g2, b2)
    return out[:M].reshape(orig_shape)


def pre_norm(x, gamma, beta, fn, *args, **kwargs):
    """Faithful PreNorm: fn(LayerNorm(x), *args, **kwargs), fn is arbitrary JAX."""
    # TODO(synk): fn is an arbitrary sub-module in the PyTorch spec; only the
    # LayerNorm is lowered to Pallas here, fn runs as plain JAX (see the fused
    # pre_norm_linear fast path below for the common fn == Linear case).
    return fn(layer_norm(x, gamma, beta), *args, **kwargs)


# ----------------------------------------------------------------------------
# Pallas kernel 2: fused LayerNorm + Linear (common PreNorm(dim, Linear) case)
#   bf16 MXU operands, f32 accumulation, LN output never leaves VMEM.
# ----------------------------------------------------------------------------
def _ln_linear_kernel(x_ref, g_ref, b_ref, w_ref, c_ref, o_ref, *, eps):
    x = x_ref[...].astype(jnp.float32)                    # (tm, D)
    mean = jnp.mean(x, axis=-1, keepdims=True)
    xc = x - mean
    var = jnp.mean(xc * xc, axis=-1, keepdims=True)
    y = xc * jax.lax.rsqrt(var + eps) * g_ref[...] + b_ref[...]
    out = jnp.dot(y.astype(jnp.bfloat16), w_ref[...],
                  preferred_element_type=jnp.float32)     # (tm, H) f32 acc
    out = out + c_ref[...]
    o_ref[...] = out.astype(o_ref.dtype)


def pre_norm_linear(x, gamma, beta, w, b, eps=1e-5, tm_req=256):
    """Fused PreNorm with fn = Linear(D -> H).  x: (..., D), w: (D, H), b: (H,)."""
    *lead, D = x.shape
    H = w.shape[1]
    x2 = x.reshape(-1, D)
    M = x2.shape[0]
    tm, M_pad = _choose_tiles(M, tm_req)
    if M_pad != M:
        x2 = jnp.pad(x2, ((0, M_pad - M), (0, 0)))
    g2 = gamma.reshape(1, D).astype(jnp.float32)
    bt2 = beta.reshape(1, D).astype(jnp.float32)
    w_bf16 = w.astype(jnp.bfloat16)                       # pre-cast once, resident
    c2 = b.reshape(1, H).astype(jnp.float32)

    out = pl.pallas_call(
        functools.partial(_ln_linear_kernel, eps=eps),
        out_shape=jax.ShapeDtypeStruct((M_pad, H), x.dtype),
        grid=(M_pad // tm,),
        in_specs=[
            pl.BlockSpec((tm, D), lambda i: (i, 0)),   # x row tile
            pl.BlockSpec((1, D), lambda i: (0, 0)),    # gamma
            pl.BlockSpec((1, D), lambda i: (0, 0)),    # beta
            pl.BlockSpec((D, H), lambda i: (0, 0)),    # W (bf16, VMEM-resident)
            pl.BlockSpec((1, H), lambda i: (0, 0)),    # linear bias
        ],
        out_specs=pl.BlockSpec((tm, H), lambda i: (i, 0)),
        compiler_params=pltpu.CompilerParams(dimension_semantics=("parallel",)),
    )(x2, g2, bt2, w_bf16, c2)
    return out[:M].reshape(*lead, H)


# ----------------------------------------------------------------------------
# demo / self-test
# ----------------------------------------------------------------------------
if __name__ == "__main__":
    key = jax.random.PRNGKey(0)
    kx, kg, kb, kw, kwb = jax.random.split(key, 5)

    # Small ViT-style shapes: batch=2, seq=8 tokens, dim=128 (lane-dense),
    # fn = Linear(dim -> 256).
    B, N, D, H = 2, 8, 128, 256
    x = jax.random.normal(kx, (B, N, D), jnp.float32)
    gamma = 1.0 + 0.1 * jax.random.normal(kg, (D,), jnp.float32)
    beta = 0.1 * jax.random.normal(kb, (D,), jnp.float32)
    w = 0.05 * jax.random.normal(kw, (D, H), jnp.float32)
    wb = 0.1 * jax.random.normal(kwb, (H,), jnp.float32)

    # Generic PreNorm path: Pallas LayerNorm, then an arbitrary JAX fn.
    fn = lambda y: jnp.dot(y, w) + wb
    out_generic = jax.block_until_ready(pre_norm(x, gamma, beta, fn))

    # Fused fast path: LayerNorm + Linear inside one Pallas kernel.
    out_fused = jax.block_until_ready(pre_norm_linear(x, gamma, beta, w, wb))

    # Pure-JAX reference (PyTorch LayerNorm: biased variance, eps=1e-5).
    mean = jnp.mean(x, axis=-1, keepdims=True)
    var = jnp.mean((x - mean) ** 2, axis=-1, keepdims=True)
    y_ref = (x - mean) / jnp.sqrt(var + 1e-5) * gamma + beta
    ref = jnp.dot(y_ref, w) + wb

    assert out_generic.shape == (B, N, H), out_generic.shape
    assert out_fused.shape == (B, N, H), out_fused.shape
    assert bool(jnp.all(jnp.isfinite(out_fused)))
    assert bool(jnp.allclose(out_generic, ref, atol=1e-3, rtol=1e-3))
    # bf16 GEMM operands with f32 accumulation -> ~1e-2 level relative error.
    assert bool(jnp.allclose(out_fused, ref, atol=3e-2, rtol=3e-2))

    print("KERNEL_OK")
</pallas_src>

<mosaic_0001>
module attributes {stable_mosaic.version = 11 : i64} {
  func.func @_ln_kernel(%arg0: i32, %arg1: memref<8x128xf32, #tpu.memory_space<vmem>>, %arg2: memref<1x128xf32, #tpu.memory_space<vmem>>, %arg3: memref<1x128xf32, #tpu.memory_space<vmem>>, %arg4: memref<8x128xf32, #tpu.memory_space<vmem>>) attributes {dimension_semantics = [#tpu.dimension_semantics<parallel>], iteration_bounds = array<i64: 2>, scalar_prefetch = 0 : i64, scratch_operands = 0 : i64, tpu.core_type = #tpu.core_type<tc>, window_params = [{transform_indices = @transform_0, window_bounds = array<i64: 8, 128>}, {pipeline_mode = #tpu.pipeline_mode<synchronous>, transform_indices = @transform_1, window_bounds = array<i64: 1, 128>}, {pipeline_mode = #tpu.pipeline_mode<synchronous>, transform_indices = @transform_2, window_bounds = array<i64: 1, 128>}, {transform_indices = @transform_3, window_bounds = array<i64: 8, 128>}]} {
    %c0 = arith.constant 0 : index
    %c0_0 = arith.constant 0 : index
    %0 = vector.load %arg1[%c0, %c0_0] : memref<8x128xf32, #tpu.memory_space<vmem>>, vector<8x128xf32>
    %cst = arith.constant dense<0.000000e+00> : vector<8xf32>
    %1 = vector.multi_reduction <add>, %0, %cst [1] : vector<8x128xf32> to vector<8xf32>
    %2 = vector.shape_cast %1 : vector<8xf32> to vector<8x1xf32>
    %cst_1 = arith.constant 1.280000e+02 : f32
    %3 = vector.broadcast %cst_1 : f32 to vector<8x1xf32>
    %4 = arith.divf %2, %3 : vector<8x1xf32>
    %5 = vector.broadcast %4 : vector<8x1xf32> to vector<8x128xf32>
    %6 = arith.subf %0, %5 : vector<8x128xf32>
    %7 = arith.mulf %6, %6 : vector<8x128xf32>
    %cst_2 = arith.constant dense<0.000000e+00> : vector<8xf32>
    %8 = vector.multi_reduction <add>, %7, %cst_2 [1] : vector<8x128xf32> to vector<8xf32>
    %9 = vector.shape_cast %8 : vector<8xf32> to vector<8x1xf32>
    %cst_3 = arith.constant 1.280000e+02 : f32
    %10 = vector.broadcast %cst_3 : f32 to vector<8x1xf32>
    %11 = arith.divf %9, %10 : vector<8x1xf32>
    %cst_4 = arith.constant 9.99999974E-6 : f32
    %12 = vector.broadcast %cst_4 : f32 to vector<8x1xf32>
    %13 = arith.addf %11, %12 : vector<8x1xf32>
    %14 = math.rsqrt %13 : vector<8x1xf32>
    %15 = vector.broadcast %14 : vector<8x1xf32> to vector<8x128xf32>
    %16 = arith.mulf %6, %15 : vector<8x128xf32>
    %c0_5 = arith.constant 0 : index
    %c0_6 = arith.constant 0 : index
    %17 = vector.load %arg2[%c0_5, %c0_6] : memref<1x128xf32, #tpu.memory_space<vmem>>, vector<1x128xf32>
    %18 = vector.broadcast %17 : vector<1x128xf32> to vector<8x128xf32>
    %19 = arith.mulf %16, %18 : vector<8x128xf32>
    %c0_7 = arith.constant 0 : index
    %c0_8 = arith.constant 0 : index
    %20 = vector.load %arg3[%c0_7, %c0_8] : memref<1x128xf32, #tpu.memory_space<vmem>>, vector<1x128xf32>
    %21 = vector.broadcast %20 : vector<1x128xf32> to vector<8x128xf32>
    %22 = arith.addf %19, %21 : vector<8x128xf32>
    %c0_9 = arith.constant 0 : index
    %c0_10 = arith.constant 0 : index
    %23 = vector.load %arg4[%c0_9, %c0_10] : memref<8x128xf32, #tpu.memory_space<vmem>>, vector<8x128xf32>
    tpu.vector_store %arg4[%c0_9, %c0_10], %22 {strides = array<i32>} : memref<8x128xf32, #tpu.memory_space<vmem>>, vector<8x128xf32>,
    return
  }
  func.func @transform_0(%arg0: i32) -> (i32, i32) {
    %c0_i32 = arith.constant 0 : i32
    %c0_i32_0 = arith.constant 0 : i32
    return %arg0, %c0_i32 : i32, i32
  }
  func.func @transform_1(%arg0: i32) -> (i32, i32) {
    %c0_i32 = arith.constant 0 : i32
    %c0_i32_0 = arith.constant 0 : i32
    %c0_i32_1 = arith.constant 0 : i32
    return %c0_i32, %c0_i32_0 : i32, i32
  }
  func.func @transform_2(%arg0: i32) -> (i32, i32) {
    %c0_i32 = arith.constant 0 : i32
    %c0_i32_0 = arith.constant 0 : i32
    %c0_i32_1 = arith.constant 0 : i32
    return %c0_i32, %c0_i32_0 : i32, i32
  }
  func.func @transform_3(%arg0: i32) -> (i32, i32) {
    %c0_i32 = arith.constant 0 : i32
    %c0_i32_0 = arith.constant 0 : i32
    return %arg0, %c0_i32 : i32, i32
  }
}

</mosaic_0001>

<bundles_post_ra>
// kernel: tpu_custom_call.1
= control target key start
LH: loop header
LB: loop body
LE: loop exit
PB: predicated region body
PF: predicated region fallthrough
CT: control target
= control target key end

     0   :  { %8 = vsyncpa [#allocation3], 0  ;;  %s715_s0 = inlined_call_operand.hbm [shape: f32[16,128], index: 0, kind: input, shape index: {}]   ;;  %s716_s1 = inlined_call_operand.hbm [shape: f32[1,128], index: 1, kind: input, shape index: {}]   ;;  %s717_s2 = inlined_call_operand.vmem [shape: f32[1,128], index: 2, kind: input, shape index: {}]   ;;  %s718_s3 = inlined_call_operand.hbm [shape: f32[16,128], index: 3, kind: output, shape index: {}]  }
   0x1   :  { %10 = vsyncpa [#allocation3 + $0x1], 0 }
   0x2   :  { %11 = vsyncpa [#allocation6], 0 }
   0x3   :  { %12 = vsyncpa [#allocation4], 0 }
   0x4   :  { %14 = vsyncpa [#allocation4 + $0x1], 0  ;;  %s570_s12 = smov 0   ;;  %s572_s13 = smov 0  }
   0x5   :  { %s574_s14 = smov 0   ;;  %s576_s15 = smov 0  }
   0x6 LB: > { %s591_s16 = sadd.s32 4294967295, %s546_s15   ;;  %s338_s17 = sadd.s32 4294967294, %s546_s15   ;;  %s546_s15 = sphi %s576_s15, %s728_s15   ;;  %s542_s14 = sphi %s574_s14, %s727_s14   ;;  %s538_s13 = sphi %s572_s13, %s726_s13   ;;  %s534_s12 = sphi %s570_s12, %s725_s12  }
   0x7   : > { %p40_p0 = scmp.ne.s32.totalorder %s538_s13, %s534_s12  ;;  %p41_p1 = scmp.eq.s32.totalorder %s591_s16, 0 }
   0x8   : > { %p106_p2 = scmp.eq.s32.totalorder %s591_s16, 1  ;;  %p112_p3 = scmp.eq.s32.totalorder %s338_s17, 1 }
   0x9   : > { %p600_p4 = por %p41_p1, %p40_p0  ;;  %p339_p5 = scmp.ge.s32.totalorder %s546_s15, 1 }
   0xa   : > { %p605_p6 = por %p112_p3, %p40_p0  ;;  %p119_p7 = scmp.lt.s32.totalorder %s546_s15, 3 }
   0xb   : > { %s131_s22 = sshll.u32 %s716_s1, 4  ;;  %s548_s24 = smov [#allocation5]   ;;  %s132_s22 = int_to_ptr.hbm [resolvable:$true] %s131_s22 }
   0xc   : > { %p613_p8 = pnand %p339_p5, %p119_p7  ;;  %s133_s25 = sshll.u32 %s548_s24, 4  ;;  %s134_s25 = int_to_ptr.vmem [resolvable:$true] %s133_s25 }
   0xd   : > { %s623_s26 = sadd.s32 1, %s546_s15   ;;  %s27_s27 = sadd.s32 1, %s542_s14 }
   0xe   : > { %p360_p10 = pneg %p613_p8  ;;  %s24_s28 = ssub.s32 %s546_s15, %s623_s26 }
   0xf   : > { %p25_p12 = scmp.eq.s32.totalorder %s24_s28, 0  ;;  %p34_p13 = scmp.ne.s32.totalorder %s542_s14, %s538_s13 }
  0x10   : > { %p361_p11 = pnand %p360_p10, %p41_p1  ;;  %p35_p0 = scmp.eq.s32.totalorder %s546_s15, 0 }
  0x11   : > { %s632_s29 = scalar_select %p25_p12, %s542_s14, %s27_s27  }
  0x12   : > { %363 = dma.hbm_to_vmem [thread:$0]  (!%p361_p11), %s132_s22, 16, %s134_s25, [#allocation6]  }
  0x13   : > { %p636_p3 = por %p106_p2, %p34_p13  ;;  %p373_p5 = scmp.lt.s32.totalorder %s546_s15, 2 }
  0x14   : > { %s147_s4 = sand.u32 1, %s542_s14   ;;  %s343_s5 = sshll.u32 %s546_s15, 3 }
  0x15   : > { %p36_p7 = por %p35_p0, %p34_p13  ;;  %s342_s6 = sshll.u32 %s147_s4, 3 }
  0x16   : > { %s155_s9 = scalar_lea.hbm %s715_s0, %s343_s5  ;;  %s151_s11 = scalar_lea.vmem [#allocation2], %s342_s6 }
  0x17   : > { %s157_s10 = sshll.u32 %s155_s9, 4  ;;  %s159_s17 = sshll.u32 %s151_s11, 4  ;;  %s158_s10 = int_to_ptr.hbm [resolvable:$true] %s157_s10  ;;  %s160_s17 = int_to_ptr.vmem [resolvable:$true] %s159_s17 }
  0x18   : > { %p646_p10 = pnand %p373_p5, %p36_p7  ;;  %s148_s21 = scalar_lea.sflag [#allocation3], %s147_s4 }
  0x19   : > { %s446_s22 = sshra.s32 %s158_s10, 4  ;;  %s453_s28 = scalar_lea.hbm %s715_s0, 16  ;;  %s447_s22 = int_to_ptr.hbm [resolvable:$true] %s446_s22 }
  0x1a   : > { %s448_s24 = scalar_lea.hbm %s447_s22, 8  ;;  %p450_p11 = pneg %p646_p10 }
  0x1b   : > { %p449_p2 = scmp.ne.s32.totalorder %s447_s22, %s448_s24  ;;  %p454_p0 = scmp.lt.s32.totalorder %s447_s22, %s715_s0 }
  0x1c   : > { %p455_p5 = scmp.lt.s32.totalorder %s453_s28, %s448_s24 }
  0x1d   : > { %p451_p12 = pnand %p450_p11, %p449_p2 }
  0x1e   : > { %p456_p7 = por %p455_p5, %p454_p0 }
  0x1f   : > { %p452_p13 = pneg %p451_p12 }
  0x21   : > { %p457_p9 = pnand %p456_p7, %p452_p13 }
  0x23   : > { %460 = shalt.err (!%p457_p9)
}
  0x24   : > { %367 = dma.hbm_to_vmem [thread:$0]  (!%p646_p10), %s158_s10, 128, %s160_s17, %s148_s21  }
  0x25   : > { %168 = sbr.rel (%p613_p8) target bundleno = 315 (0x13b), region = 32  ;;  %s663_s4 = sand.u32 (!%p613_p8), 1, %s538_s13  }
  0x26   : > { %s345_s7 = sshll.u32 (!%p613_p8), %s663_s4, 3  ;;  %s171_s8 = scalar_lea.sflag (!%p613_p8), [#allocation3], %s663_s4 }
  0x27   : > { %s174_s9 = scalar_lea.vmem (!%p613_p8), [#allocation2], %s345_s7 }
  0x2a   : > { %521 = dma.done.wait (%p600_p4), %s171_s8, 128  }
  0x2b   : > { %523 = vsyncadd (%p600_p4), %s171_s8, 4294967168 }
  0x2c   : > { %525 = dma.done.wait (%p41_p1), [#allocation6], 16  }
  0x2d   : > { %527 = vsyncadd (%p41_p1), [#allocation6], 4294967280  ;;  %v203_v0 = vld [vmem:[%s174_s9] sm:$0xff]  ;;  %v549_v1 = vmov 128.0   ;;  %s349_s18 = sshll.u32 %s591_s16, 3  ;;  %s202_s21 = scalar_lea.vmem [#allocation7], %s345_s7 }
  0x2e   : > { %204 = vadd.xlane.f32.xlu0 %v203_v0  ;;  %412 = vrcp.f32 %v549_v1  ;;  %v410_v21 = vld [vmem:[#allocation5] ss:$0 sm:$0xff]  ;;  %s253_s11 = scalar_lea.hbm %s718_s3, %s349_s18  ;;  %v411_v24 = vld [vmem:[%s717_s2] ss:$0 sm:$0xff]  ;;  %s255_s22 = sshll.u32 %s202_s21, 4  ;;  %s256_s22 = int_to_ptr.vmem [resolvable:$true] %s255_s22 }
  0x2f   : > { %s257_s16 = sshll.u32 %s253_s11, 4  ;;  %s243_s24 = scalar_lea.sflag [#allocation4], %s663_s4  ;;  %s258_s16 = int_to_ptr.hbm [resolvable:$true] %s257_s16 }
  0x30   : > { %s490_s25 = sshra.s32 %s258_s16, 4  ;;  %s496_s6 = scalar_lea.hbm %s718_s3, 16  ;;  %s491_s25 = int_to_ptr.hbm [resolvable:$true] %s490_s25 }
  0x31   : > { %s492_s27 = scalar_lea.hbm %s491_s25, 8  ;;  %p497_p9 = scmp.lt.s32.totalorder %s491_s25, %s718_s3 }
  0x32   : > { %p493_p1 = scmp.ne.s32.totalorder %s491_s25, %s492_s27  ;;  %p498_p10 = scmp.lt.s32.totalorder %s496_s6, %s492_s27 }
  0x34   : > { %v413_v2 = vpop.eup %412  ;;  %p494_p4 = pnand %p493_p1, %p636_p3  ;;  %p499_p2 = por %p498_p10, %p497_p9 }
  0x35   : > { %v207_v3 = vmul.f32 128.0, %v413_v2  ;;  %vm211_vm0 = vweird.f32 %v413_v2 }
  0x36   : > { %p495_p8 = pneg %p494_p4 }
  0x37   : > { %v208_v4 = vsub.f32 1.0, %v207_v3 }
  0x38   : > { %p500_p11 = pnand %p499_p2, %p495_p8 }
  0x39   : > { %v209_v5 = vmul.f32 %v413_v2, %v208_v4 }
  0x3b   : > { %v210_v6 = vadd.f32 %v413_v2, %v209_v5 }
  0x3d   : > { %v212_v7 = vsel %vm211_vm0, %v413_v2, %v210_v6 }
  0xa1   : > { %v205_v8 = vpop.xlane.xlu0 %204 }
  0xa2   : > { %v213_v9 = vmul.f32 %v212_v7, %v205_v8 }
  0xa4   : > { %v214_v10 = vsub.f32 %v203_v0, %v213_v9 }
  0xa6   : > { %v215_v11 = vmul.f32 %v214_v10, %v214_v10 }
  0xa8   : > { %216 = vadd.xlane.f32.xlu0 %v215_v11 }
 0x11b   : > { %v217_v12 = vpop.xlane.xlu0 %216 }
 0x11c   : > { %v218_v13 = vmul.f32 %v217_v12, %v212_v7 }
 0x11e   : > { %v219_v14 = vadd.f32 1e-05, %v218_v13 }
 0x120   : > { %414 = vrsqrt.f32 %v219_v14  ;;  %vm226_vm2 = vweird.f32 %v219_v14 }
 0x126   : > { %v415_v15 = vpop.eup %414 }
 0x127   : > { %v221_v16 = vmul.f32 %v415_v15, %v219_v14  ;;  %vm227_vm1 = vweird.f32 %v415_v15 }
 0x128   : > { %vm228_vm3 = vmor %vm226_vm2, %vm227_vm1 }
 0x129   : > { %v222_v17 = vmul.f32 %v415_v15, %v221_v16 }
 0x12b   : > { %v223_v18 = vmul.f32 0.5, %v222_v17 }
 0x12d   : > { %v224_v19 = vsub.f32 1.5, %v223_v18 }
 0x12f   : > { %v225_v20 = vmul.f32 %v415_v15, %v224_v19 }
 0x131   : > { %v229_v22 = vsel %vm228_vm3, %v415_v15, %v225_v20 }
 0x132   : > { %v230_v23 = vmul.f32 %v229_v22, %v214_v10 }
 0x134   : > { %v235_v25 = vmul.f32 %v410_v21, %v230_v23 }
 0x136   : > { %v240_v26 = vadd.f32 %v411_v24, %v235_v25 }
 0x138   : > { %241 = vst [vmem:[%s202_s21] sm:$0xff] %v240_v26 }
 0x139   : > { %503 = shalt.err (!%p500_p11)
}
 0x13a   : > { %358 = dma.vmem_to_hbm [thread:$0]  (%p636_p3), %s256_s22, 128, %s258_s16, %s243_s24  }
 0x13b PF: > { %s269_s4 = sand.u32 1, %s534_s12   ;;  %p724_p12 = scmp.ge.s32.totalorder %s546_s15, 2 }
 0x13c   : > { %s270_s9 = scalar_lea.sflag [#allocation4], %s269_s4 }
 0x13d   : > { %p369_p13 = pnand %p724_p12, %p605_p6 }
 0x13f   : > { %p370_p0 = pneg %p369_p13 }
 0x141   : > { %529 = dma.done.wait (%p370_p0), %s270_s9, 128  }
 0x142   : > { %531 = vsyncadd (%p370_p0), %s270_s9, 4294967168  ;;  %p17_p5 = scmp.ge.s32.totalorder %s623_s26, 4   ;;  %s725_s12 = smov %s538_s13 }
 0x143   : > { %s726_s13 = smov %s542_s14  ;;  %s727_s14 = smov %s632_s29 }
 0x144   : > { %s728_s15 = smov %s623_s26  ;;  %19 = sbr.rel (!%p17_p5) target bundleno = 6 (0x6), region = 81 }
 0x149   :  { %276 = vsyncpa [#allocation3], 1 }
 0x14a   :  { %278 = vsyncpa [#allocation3 + $0x1], 1 }
 0x14b   :  { %279 = vsyncpa [#allocation6], 1 }
 0x14c   :  { %280 = vsyncpa [#allocation4], 1 }
 0x14d   :  { %282 = vsyncpa [#allocation4 + $0x1], 1 }

</bundles_post_ra>
